<compile_context>
chip_gen: v5e
topology: v5e:2x2
jax: 0.10.0
libtpu: 0.0.40
codegen_flags: <defaults>
</compile_context>

<pallas_src>
import jax
import jax.numpy as jnp
from jax.experimental import pallas as pl
from jax.experimental.pallas import tpu as pltpu

_HI = 1000.0
_LO = -1000.0


def _xor_logits_kernel(x_ref, o_ref):
    # x_ref: (R, TC) -- R = reduction axis (modalities or features), TC lanes.
    # o_ref: (2, TC) -- row 0 = class-0 logits, row 1 = class-1 logits.
    x = x_ref[...].astype(jnp.float32)
    s = jnp.sum(x, axis=0, keepdims=True)                     # (1, TC)
    is_one = (s == 1.0).astype(jnp.int32)                     # labels == 1 -> 1 else 0
    is_one_b = jnp.broadcast_to(is_one, o_ref.shape)          # (2, TC)
    row = jax.lax.broadcasted_iota(jnp.int32, o_ref.shape, 0)  # row index 0 / 1
    # Row r holds +1000 where label == r, else -1000.
    o_ref[...] = jnp.where(row == is_one_b, _HI, _LO)


def _xor_logits_2d(org_X, *, tile_c=2048):
    """org_X: (R, C) float -> logits (C, 2), matching the PyTorch forward."""
    org_X = jnp.asarray(org_X, jnp.float32)
    R, C = org_X.shape

    # Lane tile: big multiple of 128 to amortize per-step overhead; a
    # full-extent block is always legal when C is not lane-aligned.
    if C % 128 == 0:
        tc = min(tile_c, C)
    else:
        tc = C

    out2 = pl.pallas_call(
        _xor_logits_kernel,
        out_shape=jax.ShapeDtypeStruct((2, C), jnp.float32),
        grid=(pl.cdiv(C, tc),),
        in_specs=[pl.BlockSpec((R, tc), lambda i: (0, i))],
        out_specs=pl.BlockSpec((2, tc), lambda i: (0, i)),
        compiler_params=pltpu.CompilerParams(
            dimension_semantics=("parallel",)),
    )(org_X)
    # (C, 2) == torch.stack((logits_0, logits_1), dim=1)
    return out2.T


def original_function_xor(X, setting="synergy"):
    """JAX/Pallas port of OrginalFunctionXOR.forward."""
    if "unique" in setting:
        assert setting and setting[-1].isdigit(), (
            "Last char has to be the number of the modality that should "
            "determine the label (starts with 0)")
        k = int(setting[-1])
        org = jnp.asarray(X[k]).T
    else:
        mods = []
        for x in X:
            x = jnp.asarray(x)
            if x.ndim > 1 and x.shape[0] == 1:   # torch squeeze(dim=0) semantics
                x = jnp.squeeze(x, axis=0)
            mods.append(x)
        org = jnp.stack(mods)

    if org.ndim == 1:
        # Scalar-per-modality edge case (torch's `except: stack(dim=0)` branch).
        return _xor_logits_2d(org[:, None])[0]   # shape (2,)
    return _xor_logits_2d(org)                   # shape (N, 2)


def _reference(X, setting="synergy"):
    """Pure-JAX reference mirroring the PyTorch module."""
    if "unique" in setting:
        org = jnp.asarray(X[int(setting[-1])]).T
    else:
        mods = []
        for x in X:
            x = jnp.asarray(x)
            if x.ndim > 1 and x.shape[0] == 1:
                x = jnp.squeeze(x, axis=0)
            mods.append(x)
        org = jnp.stack(mods)
    labels = jnp.where(jnp.sum(org, axis=0) == 1, 1, 0)
    logits_1 = jnp.where(labels == 1, _HI, _LO)
    logits_0 = jnp.where(labels == 0, _HI, _LO)
    return jnp.stack((logits_0, logits_1), axis=-1)


if __name__ == "__main__":
    key = jax.random.PRNGKey(0)
    k0, k1, k2 = jax.random.split(key, 3)

    n_samples = 256  # multiple of 128 -> lane-dense tiles

    # --- 'synergy' (classic XOR) setting: two binary modalities, (N,) each ---
    x0 = jax.random.bernoulli(k0, 0.5, (n_samples,)).astype(jnp.float32)
    x1 = jax.random.bernoulli(k1, 0.5, (n_samples,)).astype(jnp.float32)
    X_syn = [x0, x1]
    out_syn = jax.block_until_ready(original_function_xor(X_syn, "synergy"))
    ref_syn = _reference(X_syn, "synergy")
    assert out_syn.shape == (n_samples, 2), out_syn.shape
    assert jnp.array_equal(out_syn, ref_syn), "synergy mismatch vs reference"

    # --- 'unique0' setting: label determined by modality 0 of shape (N, D) ---
    d = 8
    xu = jax.random.bernoulli(k2, 0.2, (n_samples, d)).astype(jnp.float32)
    X_uni = [xu, x1]
    out_uni = jax.block_until_ready(original_function_xor(X_uni, "unique0"))
    ref_uni = _reference(X_uni, "unique0")
    assert out_uni.shape == (n_samples, 2), out_uni.shape
    assert jnp.array_equal(out_uni, ref_uni), "unique0 mismatch vs reference"

    print("KERNEL_OK")
</pallas_src>

<mosaic_0001>
module attributes {stable_mosaic.version = 11 : i64} {
  func.func @_xor_logits_kernel(%arg0: i32, %arg1: memref<2x256xf32, #tpu.memory_space<vmem>>, %arg2: memref<2x256xf32, #tpu.memory_space<vmem>>) attributes {dimension_semantics = [#tpu.dimension_semantics<parallel>], iteration_bounds = array<i64: 1>, scalar_prefetch = 0 : i64, scratch_operands = 0 : i64, tpu.core_type = #tpu.core_type<tc>, window_params = [{transform_indices = @transform_0, window_bounds = array<i64: 2, 256>}, {transform_indices = @transform_1, window_bounds = array<i64: 2, 256>}]} {
    %c0 = arith.constant 0 : index
    %c0_0 = arith.constant 0 : index
    %0 = vector.load %arg1[%c0, %c0_0] : memref<2x256xf32, #tpu.memory_space<vmem>>, vector<2x256xf32>
    %cst = arith.constant dense<0.000000e+00> : vector<256xf32>
    %1 = vector.multi_reduction <add>, %0, %cst [0] : vector<2x256xf32> to vector<256xf32>
    %2 = vector.shape_cast %1 : vector<256xf32> to vector<1x256xf32>
    %cst_1 = arith.constant 1.000000e+00 : f32
    %3 = vector.broadcast %cst_1 : f32 to vector<1x256xf32>
    %4 = arith.cmpf oeq, %2, %3 : vector<1x256xf32>
    %5 = arith.extui %4 : vector<1x256xi1> to vector<1x256xi32>
    %6 = vector.shape_cast %5 : vector<1x256xi32> to vector<1x256xi32>
    %7 = vector.broadcast %6 : vector<1x256xi32> to vector<2x256xi32>
    %8 = tpu.iota {dimensions = array<i32: 0>} : vector<2x256xi32>
    %9 = arith.cmpi eq, %8, %7 : vector<2x256xi32>
    %cst_2 = arith.constant 1.000000e+03 : f32
    %cst_3 = arith.constant -1.000000e+03 : f32
    %10 = vector.broadcast %cst_2 : f32 to vector<2x256xf32>
    %11 = vector.broadcast %cst_3 : f32 to vector<2x256xf32>
    %12 = arith.select %9, %10, %11 : vector<2x256xi1>, vector<2x256xf32>
    %c0_4 = arith.constant 0 : index
    %c0_5 = arith.constant 0 : index
    %13 = vector.load %arg2[%c0_4, %c0_5] : memref<2x256xf32, #tpu.memory_space<vmem>>, vector<2x256xf32>
    tpu.vector_store %arg2[%c0_4, %c0_5], %12 {strides = array<i32>} : memref<2x256xf32, #tpu.memory_space<vmem>>, vector<2x256xf32>,
    return
  }
  func.func @transform_0(%arg0: i32) -> (i32, i32) {
    %c0_i32 = arith.constant 0 : i32
    %c0_i32_0 = arith.constant 0 : i32
    return %c0_i32, %arg0 : i32, i32
  }
  func.func @transform_1(%arg0: i32) -> (i32, i32) {
    %c0_i32 = arith.constant 0 : i32
    %c0_i32_0 = arith.constant 0 : i32
    return %c0_i32, %arg0 : i32, i32
  }
}

</mosaic_0001>

<bundles_post_ra>
// kernel: tpu_custom_call.1
= control target key start
LH: loop header
LB: loop body
LE: loop exit
PB: predicated region body
PF: predicated region fallthrough
CT: control target
= control target key end

     0   :  { %6 = vsyncpa [#allocation3], 0  ;;  %s157_s0 = inlined_call_operand.hbm [shape: f32[2,256], index: 0, kind: input, shape index: {}]   ;;  %s158_s1 = inlined_call_operand.hbm [shape: f32[2,256], index: 1, kind: output, shape index: {}]  }
   0x1   :  { %7 = vsyncpa [#allocation4], 0  ;;  %s13_s8 = sshll.u32 %s157_s0, 4  ;;  %s134_s9 = smov [#allocation2]   ;;  %s14_s8 = int_to_ptr.hbm [resolvable:$true] %s13_s8 }
   0x2   :  { %s15_s10 = sshll.u32 %s134_s9, 4  ;;  %s16_s10 = int_to_ptr.vmem [resolvable:$true] %s15_s10 }
   0x3   :  { %18 = dma.hbm_to_vmem [thread:$0]  %s14_s8, 64, %s16_s10, [#allocation3]  }
   0x4   :  { %130 = dma.done.wait [#allocation3], 64  }
   0x5   :  { %131 = vsyncadd [#allocation3], 4294967232  ;;  %v23_v0 = vld [vmem:[#allocation2] sm:$0xf]  ;;  %vm30_vm0 = vcmask 1041408   ;;  %v49_v13 = vlaneseq  ;;  %v135_v19 = vmov 0  }
   0x6   :  { %25 = vst [vmem:[#allocation1] ss:$4 sm:$0xff] %v23_v0  ;;  %s136_s0 = smov [#allocation5]   ;;  %s68_s14 = sshll.u32 %s158_s1, 4  ;;  %v137_v22 = vmov -1000.0   ;;  %s69_s14 = int_to_ptr.hbm [resolvable:$true] %s68_s14 }
   0x7   :  { %v50_v18 = vshrl.u32 %v49_v13, 7  ;;  %s66_s11 = sshll.u32 %s136_s0, 4  ;;  %s67_s11 = int_to_ptr.vmem [resolvable:$true] %s66_s11 }
   0xd   :  { %v26_v1 = vld.sshfl [vmem:[#allocation1] sm:$0xff pattern:$0x73625140]  ;;  %v27_v2 = vld.sshfl [vmem:[#allocation1 + $0x8] sm:$0xff pattern:$0x73625140] }
   0xe   :  { %v31_v3 = vsel %vm30_vm0, %v26_v1, 0.0  ;;  %v38_v4 = vsel %vm30_vm0, %v27_v2, 0.0 }
   0xf   :  { %v32_v5 = vrot.slane %v31_v3, 4  ;;  %v39_v6 = vrot.slane %v38_v4, 4 }
  0x11   :  { %v33_v7 = vadd.f32 %v32_v5, %v31_v3  ;;  %v40_v8 = vadd.f32 %v39_v6, %v38_v4 }
  0x13   :  { %v34_v9 = vrot.slane %v33_v7, 2  ;;  %v41_v10 = vrot.slane %v40_v8, 2 }
  0x15   :  { %v35_v11 = vadd.f32 %v34_v9, %v33_v7  ;;  %v42_v12 = vadd.f32 %v41_v10, %v40_v8 }
  0x17   :  { %v36_v14 = vrot.slane %v35_v11, 1  ;;  %v43_v15 = vrot.slane %v42_v12, 1 }
  0x19   :  { %v37_v16 = vadd.f32 %v36_v14, %v35_v11  ;;  %v44_v17 = vadd.f32 %v43_v15, %v42_v12 }
  0x1b   :  { %vm45_vm1 = vcmp.eq.f32.partialorder %v37_v16, 1.0  ;;  %vm46_vm2 = vcmp.eq.f32.partialorder %v44_v17, 1.0 }
  0x1c   :  { %v47_v20 = vsel %vm45_vm1, 1, %v135_v19  ;;  %v48_v21 = vsel %vm46_vm2, 1, %v135_v19 }
  0x1d   :  { %vm51_vm3 = vcmp.eq.s32.totalorder %v50_v18, %v47_v20  ;;  %vm52_vm4 = vcmp.eq.s32.totalorder %v50_v18, %v48_v21 }
  0x1e   :  { %v54_v23 = vsel %vm52_vm4, 1000.0, %v137_v22  ;;  %v53_v25 = vsel %vm51_vm3, 1000.0, %v137_v22 }
  0x1f   :  { %v57_v24 = vrot.slane %v54_v23, 6 }
  0x21   :  { %v58_v26 = vsel %vm30_vm0, %v53_v25, %v57_v24 }
  0x22   :  { %60 = vst [vmem:[#allocation5] sm:$0xf] %v58_v26 }
  0x23   :  { %71 = dma.vmem_to_hbm [thread:$0]  %s67_s11, 64, %s69_s14, [#allocation4]  }
  0x24   :  { %132 = dma.done.wait [#allocation4], 64  }
  0x25   :  { %133 = vsyncadd [#allocation4], 4294967232 }
  0x26   :  { %76 = vsyncpa [#allocation3], 1 }
  0x27   :  { %77 = vsyncpa [#allocation4], 1 }

</bundles_post_ra>
